<compile_context>
chip_gen: v7x
topology: tpu7x:2x2x1
jax: 0.10.0
libtpu: 0.0.40
codegen_flags: <defaults>
</compile_context>

<pallas_src>
import functools

import jax
import jax.numpy as jnp
from jax import lax
from jax.experimental import pallas as pl
from jax.experimental.pallas import tpu as pltpu


_NBUF = 8          # in-flight row DMAs for the HBM gather path
_ROW_UNROLL = 8    # rows copied per fori_loop iteration in the VMEM path


def _gather_vmem_kernel(ids_ref, table_ref, out_ref):
    """Row gather from a VMEM-resident table.

    ids_ref:   (n_pad,) int32 in SMEM (scalar-prefetched token ids).
    table_ref: (V, Ep)  embedding table, resident in VMEM across the grid.
    out_ref:   (tok, Ep) output tile for this grid step (lane-dense Ep).
    """
    tok = out_ref.shape[0]
    base = pl.program_id(0) * tok

    def body(jj, carry):
        j0 = pl.multiple_of(jj * _ROW_UNROLL, _ROW_UNROLL)
        for u in range(_ROW_UNROLL):          # static unroll: 8 rows / iter
            j = j0 + u
            row = ids_ref[base + j]
            out_ref[pl.ds(j, 1), :] = table_ref[pl.ds(row, 1), :]
        return carry

    lax.fori_loop(0, tok // _ROW_UNROLL, body, 0)
    # TODO(synk): replace the row loop with a vectorized sublane gather
    # (jnp.take on the VMEM table) once Mosaic's dynamic_gather lowering
    # supports arbitrary-V row gathers.


def _gather_hbm_kernel(tok, ids_ref, table_ref, out_ref, sem):
    """Row gather streamed straight out of HBM with a ring of _NBUF DMAs.

    ids_ref:   (n_pad,) int32 in SMEM (scalar-prefetched token ids).
    table_ref: (V, Ep)  embedding table, left in HBM (memory_space=pl.ANY).
    out_ref:   (n_pad, Ep) output, left in HBM (memory_space=pl.ANY).
    sem:       (_NBUF,) DMA semaphores (one per in-flight row copy).
    """
    base = pl.program_id(0) * tok

    def row_copy(j):
        row = ids_ref[base + j]
        return pltpu.make_async_copy(
            table_ref.at[pl.ds(row, 1)],        # (1, Ep) row in HBM
            out_ref.at[pl.ds(base + j, 1)],     # (1, Ep) row in HBM
            sem.at[j % _NBUF],
        )

    # Prime the DMA ring.
    for j in range(_NBUF):
        row_copy(j).start()

    # Steady state: retire row j, launch row j + _NBUF on the freed slot.
    def stream(j, carry):
        row_copy(j).wait()
        row_copy(j + _NBUF).start()
        return carry

    lax.fori_loop(0, tok - _NBUF, stream, 0)

    # Drain the last _NBUF outstanding copies.
    def drain(j, carry):
        row_copy(j).wait()
        return carry

    lax.fori_loop(tok - _NBUF, tok, drain, 0)


def embedding_lookup(x, word_table, *, tok_tile=512,
                     table_vmem_budget_bytes=24 * 2**20):
    """out[...] = word_table[x[...]]  (frozen nn.Embedding forward)."""
    V, E = word_table.shape
    orig_shape = x.shape
    out_dtype = word_table.dtype

    ids = x.reshape(-1).astype(jnp.int32)
    n = int(ids.shape[0])
    if n == 0:
        return jnp.zeros((*orig_shape, E), out_dtype)

    # Lane-dense embedding dim: pad E up to a multiple of 128 so stores / DMAs
    # are full-lane (real embedding dims are usually already 128-multiples).
    Ep = ((E + 127) // 128) * 128
    table = word_table if Ep == E else jnp.pad(word_table, ((0, 0), (0, Ep - E)))

    itemsize = jnp.dtype(out_dtype).itemsize
    table_bytes = V * Ep * itemsize

    # Token tile: big enough to amortize the ~0.35us/grid-step overhead, small
    # enough that the (tok, Ep) output tile stays ~<= 2 MiB; multiple of 8,
    # at least _NBUF.
    tok_cap = max(_NBUF, ((2 * 2**20) // (Ep * itemsize)) // 8 * 8)
    tok = min(int(tok_tile), tok_cap, (n + 7) // 8 * 8)
    tok = max(_NBUF, tok // 8 * 8)
    n_pad = (n + tok - 1) // tok * tok
    if n_pad != n:
        ids = jnp.pad(ids, (0, n_pad - n))     # pads gather row 0, sliced off below
    grid = (n_pad // tok,)

    # TODO(synk): ids are scalar-prefetched whole into SMEM; for extremely long
    # token streams (>~256K tokens) chunk the call instead.

    if table_bytes <= table_vmem_budget_bytes:
        # ---------------- table resident in VMEM --------------------------
        # The pipeline reserves 2x the table block (double buffering) even
        # though the constant index_map means it is DMA'd only once; the
        # budget math accounts for that.
        # TODO(synk): pipeline_mode=pl.Buffered(1) on the table BlockSpec would
        # halve that reservation; left off here for lowering robustness.
        out_tile_bytes = tok * Ep * itemsize * 2
        vmem_limit = int(min(60 * 2**20,
                             max(32 * 2**20,
                                 2 * table_bytes + out_tile_bytes + 4 * 2**20)))
        out_padded = pl.pallas_call(
            _gather_vmem_kernel,
            out_shape=jax.ShapeDtypeStruct((n_pad, Ep), out_dtype),
            grid_spec=pltpu.PrefetchScalarGridSpec(
                num_scalar_prefetch=1,
                grid=grid,
                in_specs=[
                    pl.BlockSpec((V, Ep), lambda i, ids_ref: (0, 0)),
                ],
                out_specs=pl.BlockSpec((tok, Ep), lambda i, ids_ref: (i, 0)),
            ),
            compiler_params=pltpu.CompilerParams(
                dimension_semantics=("parallel",),
                vmem_limit_bytes=vmem_limit),
        )(ids, table)
    else:
        # ---------------- large table: stream rows from HBM ---------------
        out_padded = pl.pallas_call(
            functools.partial(_gather_hbm_kernel, tok),
            out_shape=jax.ShapeDtypeStruct((n_pad, Ep), out_dtype),
            grid_spec=pltpu.PrefetchScalarGridSpec(
                num_scalar_prefetch=1,
                grid=grid,
                in_specs=[pl.BlockSpec(memory_space=pl.ANY)],
                out_specs=pl.BlockSpec(memory_space=pl.ANY),
                scratch_shapes=[pltpu.SemaphoreType.DMA((_NBUF,))],
            ),
            compiler_params=pltpu.CompilerParams(
                dimension_semantics=("arbitrary",)),
        )(ids, table)

    out = out_padded[:n, :E]
    return out.reshape(*orig_shape, E)


def _reference(x, word_table):
    return jnp.take(word_table, x, axis=0)


if __name__ == "__main__":
    # Small synthetic shapes consistent with an embedding lookup.
    B, S = 2, 8        # batch, sequence of token ids
    V, E = 128, 32     # vocab size, embedding dim

    key = jax.random.PRNGKey(0)
    k_tab, k_ids = jax.random.split(key, 2)

    word_table = jax.random.normal(k_tab, (V, E), dtype=jnp.float32)
    x = jax.random.randint(k_ids, (B, S), 0, V, dtype=jnp.int32)

    ref = _reference(x, word_table)

    # Path 1: VMEM-resident table (default for small/medium vocabs).
    out = jax.block_until_ready(embedding_lookup(x, word_table))
    assert out.shape == (B, S, E), out.shape
    assert jnp.array_equal(out, ref), float(jnp.max(jnp.abs(out - ref)))

    # Path 2: force the large-vocab HBM row-gather DMA path on the same data.
    out_hbm = jax.block_until_ready(
        embedding_lookup(x, word_table, table_vmem_budget_bytes=0))
    assert out_hbm.shape == (B, S, E), out_hbm.shape
    assert jnp.array_equal(out_hbm, ref), float(jnp.max(jnp.abs(out_hbm - ref)))

    print("KERNEL_OK")
</pallas_src>

<mosaic_0001>
module attributes {stable_mosaic.version = 11 : i64} {
  func.func @_gather_vmem_kernel(%arg0: i32, %arg1: memref<16xi32, #tpu.memory_space<smem>>, %arg2: memref<128x128xf32, #tpu.memory_space<vmem>>, %arg3: memref<16x128xf32, #tpu.memory_space<vmem>>) attributes {dimension_semantics = [#tpu.dimension_semantics<parallel>], iteration_bounds = array<i64: 1>, scalar_prefetch = 1 : i64, scratch_operands = 0 : i64, tpu.core_type = #tpu.core_type<tc>, window_params = [{pipeline_mode = #tpu.pipeline_mode<synchronous>, transform_indices = @transform_0, window_bounds = array<i64: 128, 128>}, {transform_indices = @transform_1, window_bounds = array<i64: 16, 128>}]} {
    %c16_i32 = arith.constant 16 : i32
    %0 = arith.muli %arg0, %c16_i32 : i32
    %c0_i32 = arith.constant 0 : i32
    %c2_i32 = arith.constant 2 : i32
    %1 = arith.addi %c0_i32, %c2_i32 : i32
    %c1_i32 = arith.constant 1 : i32
    scf.for %arg4 = %c0_i32 to %1 step %c1_i32  : i32 {
      %c8_i32 = arith.constant 8 : i32
      %2 = arith.muli %arg4, %c8_i32 : i32
      %3 = tpu.assume_multiple %2, 8 : i32
      %c0_i32_1 = arith.constant 0 : i32
      %4 = arith.addi %3, %c0_i32_1 : i32
      %5 = arith.addi %0, %4 : i32
      %6 = arith.index_cast %5 : i32 to index
      %7 = memref.load %arg1[%6] : memref<16xi32, #tpu.memory_space<smem>>
      %8 = arith.index_cast %7 : i32 to index
      %c0 = arith.constant 0 : index
      %9 = vector.load %arg2[%8, %c0] : memref<128x128xf32, #tpu.memory_space<vmem>>, vector<1x128xf32>
      %10 = arith.index_cast %4 : i32 to index
      %c0_2 = arith.constant 0 : index
      %11 = vector.load %arg3[%10, %c0_2] : memref<16x128xf32, #tpu.memory_space<vmem>>, vector<1x128xf32>
      tpu.vector_store %arg3[%10, %c0_2], %9 {strides = array<i32>} : memref<16x128xf32, #tpu.memory_space<vmem>>, vector<1x128xf32>,
      %c1_i32_3 = arith.constant 1 : i32
      %12 = arith.addi %3, %c1_i32_3 : i32
      %13 = arith.addi %0, %12 : i32
      %14 = arith.index_cast %13 : i32 to index
      %15 = memref.load %arg1[%14] : memref<16xi32, #tpu.memory_space<smem>>
      %16 = arith.index_cast %15 : i32 to index
      %c0_4 = arith.constant 0 : index
      %17 = vector.load %arg2[%16, %c0_4] : memref<128x128xf32, #tpu.memory_space<vmem>>, vector<1x128xf32>
      %18 = arith.index_cast %12 : i32 to index
      %c0_5 = arith.constant 0 : index
      %19 = vector.load %arg3[%18, %c0_5] : memref<16x128xf32, #tpu.memory_space<vmem>>, vector<1x128xf32>
      tpu.vector_store %arg3[%18, %c0_5], %17 {strides = array<i32>} : memref<16x128xf32, #tpu.memory_space<vmem>>, vector<1x128xf32>,
      %c2_i32_6 = arith.constant 2 : i32
      %20 = arith.addi %3, %c2_i32_6 : i32
      %21 = arith.addi %0, %20 : i32
      %22 = arith.index_cast %21 : i32 to index
      %23 = memref.load %arg1[%22] : memref<16xi32, #tpu.memory_space<smem>>
      %24 = arith.index_cast %23 : i32 to index
      %c0_7 = arith.constant 0 : index
      %25 = vector.load %arg2[%24, %c0_7] : memref<128x128xf32, #tpu.memory_space<vmem>>, vector<1x128xf32>
      %26 = arith.index_cast %20 : i32 to index
      %c0_8 = arith.constant 0 : index
      %27 = vector.load %arg3[%26, %c0_8] : memref<16x128xf32, #tpu.memory_space<vmem>>, vector<1x128xf32>
      tpu.vector_store %arg3[%26, %c0_8], %25 {strides = array<i32>} : memref<16x128xf32, #tpu.memory_space<vmem>>, vector<1x128xf32>,
      %c3_i32 = arith.constant 3 : i32
      %28 = arith.addi %3, %c3_i32 : i32
      %29 = arith.addi %0, %28 : i32
      %30 = arith.index_cast %29 : i32 to index
      %31 = memref.load %arg1[%30] : memref<16xi32, #tpu.memory_space<smem>>
      %32 = arith.index_cast %31 : i32 to index
      %c0_9 = arith.constant 0 : index
      %33 = vector.load %arg2[%32, %c0_9] : memref<128x128xf32, #tpu.memory_space<vmem>>, vector<1x128xf32>
      %34 = arith.index_cast %28 : i32 to index
      %c0_10 = arith.constant 0 : index
      %35 = vector.load %arg3[%34, %c0_10] : memref<16x128xf32, #tpu.memory_space<vmem>>, vector<1x128xf32>
      tpu.vector_store %arg3[%34, %c0_10], %33 {strides = array<i32>} : memref<16x128xf32, #tpu.memory_space<vmem>>, vector<1x128xf32>,
      %c4_i32 = arith.constant 4 : i32
      %36 = arith.addi %3, %c4_i32 : i32
      %37 = arith.addi %0, %36 : i32
      %38 = arith.index_cast %37 : i32 to index
      %39 = memref.load %arg1[%38] : memref<16xi32, #tpu.memory_space<smem>>
      %40 = arith.index_cast %39 : i32 to index
      %c0_11 = arith.constant 0 : index
      %41 = vector.load %arg2[%40, %c0_11] : memref<128x128xf32, #tpu.memory_space<vmem>>, vector<1x128xf32>
      %42 = arith.index_cast %36 : i32 to index
      %c0_12 = arith.constant 0 : index
      %43 = vector.load %arg3[%42, %c0_12] : memref<16x128xf32, #tpu.memory_space<vmem>>, vector<1x128xf32>
      tpu.vector_store %arg3[%42, %c0_12], %41 {strides = array<i32>} : memref<16x128xf32, #tpu.memory_space<vmem>>, vector<1x128xf32>,
      %c5_i32 = arith.constant 5 : i32
      %44 = arith.addi %3, %c5_i32 : i32
      %45 = arith.addi %0, %44 : i32
      %46 = arith.index_cast %45 : i32 to index
      %47 = memref.load %arg1[%46] : memref<16xi32, #tpu.memory_space<smem>>
      %48 = arith.index_cast %47 : i32 to index
      %c0_13 = arith.constant 0 : index
      %49 = vector.load %arg2[%48, %c0_13] : memref<128x128xf32, #tpu.memory_space<vmem>>, vector<1x128xf32>
      %50 = arith.index_cast %44 : i32 to index
      %c0_14 = arith.constant 0 : index
      %51 = vector.load %arg3[%50, %c0_14] : memref<16x128xf32, #tpu.memory_space<vmem>>, vector<1x128xf32>
      tpu.vector_store %arg3[%50, %c0_14], %49 {strides = array<i32>} : memref<16x128xf32, #tpu.memory_space<vmem>>, vector<1x128xf32>,
      %c6_i32 = arith.constant 6 : i32
      %52 = arith.addi %3, %c6_i32 : i32
      %53 = arith.addi %0, %52 : i32
      %54 = arith.index_cast %53 : i32 to index
      %55 = memref.load %arg1[%54] : memref<16xi32, #tpu.memory_space<smem>>
      %56 = arith.index_cast %55 : i32 to index
      %c0_15 = arith.constant 0 : index
      %57 = vector.load %arg2[%56, %c0_15] : memref<128x128xf32, #tpu.memory_space<vmem>>, vector<1x128xf32>
      %58 = arith.index_cast %52 : i32 to index
      %c0_16 = arith.constant 0 : index
      %59 = vector.load %arg3[%58, %c0_16] : memref<16x128xf32, #tpu.memory_space<vmem>>, vector<1x128xf32>
      tpu.vector_store %arg3[%58, %c0_16], %57 {strides = array<i32>} : memref<16x128xf32, #tpu.memory_space<vmem>>, vector<1x128xf32>,
      %c7_i32 = arith.constant 7 : i32
      %60 = arith.addi %3, %c7_i32 : i32
      %61 = arith.addi %0, %60 : i32
      %62 = arith.index_cast %61 : i32 to index
      %63 = memref.load %arg1[%62] : memref<16xi32, #tpu.memory_space<smem>>
      %64 = arith.index_cast %63 : i32 to index
      %c0_17 = arith.constant 0 : index
      %65 = vector.load %arg2[%64, %c0_17] : memref<128x128xf32, #tpu.memory_space<vmem>>, vector<1x128xf32>
      %66 = arith.index_cast %60 : i32 to index
      %c0_18 = arith.constant 0 : index
      %67 = vector.load %arg3[%66, %c0_18] : memref<16x128xf32, #tpu.memory_space<vmem>>, vector<1x128xf32>
      tpu.vector_store %arg3[%66, %c0_18], %65 {strides = array<i32>} : memref<16x128xf32, #tpu.memory_space<vmem>>, vector<1x128xf32>,
    }
    %c2_i32_0 = arith.constant 2 : i32
    return
  }
  func.func @transform_0(%arg0: i32, %arg1: memref<16xi32, #tpu.memory_space<smem>>) -> (i32, i32) {
    %c0_i32 = arith.constant 0 : i32
    %c0_i32_0 = arith.constant 0 : i32
    %c0_i32_1 = arith.constant 0 : i32
    return %c0_i32, %c0_i32_0 : i32, i32
  }
  func.func @transform_1(%arg0: i32, %arg1: memref<16xi32, #tpu.memory_space<smem>>) -> (i32, i32) {
    %c0_i32 = arith.constant 0 : i32
    %c0_i32_0 = arith.constant 0 : i32
    return %arg0, %c0_i32 : i32, i32
  }
}

</mosaic_0001>

<bundles_post_ra>
// kernel: tpu_custom_call.1
= control target key start
LH: loop header
LB: loop body
LE: loop exit
PB: predicated region body
PF: predicated region fallthrough
CT: control target
= control target key end

     0   :  { %s311_s0 = inlined_call_operand.hbm [shape: s32[16], index: 0, kind: input, shape index: {}]   ;;  %s312_s1 = inlined_call_operand.hbm [shape: f32[128,128], index: 1, kind: input, shape index: {}]   ;;  %s313_s2 = inlined_call_operand.hbm [shape: f32[16,128], index: 2, kind: output, shape index: {}]  }
   0x1   :  { %s172_s11 = scalar_lea.hbm %s311_s0, 16 }
   0x2   :  { %p173_p0 = scmp.ne.s32.totalorder %s311_s0, %s172_s11  ;;  %p176_p1 = scmp.lt.u32.totalorder %s172_s11, %s311_s0 }
   0x4   :  { %p178_p2 = pnand %p176_p1, %p173_p0 }
   0x6   :  { %181 = shalt.err (!%p178_p2)  }
   0x7   :  { %s240_s16 = smov [#allocation3]  }
   0x8   :  { %8 = dma.hbm_to_smem %s311_s0, 16, %s240_s16, [#allocation2] }
   0x9   :  { %230 = dma.done.wait [#allocation2], 16 }
   0xa   :  { %231 = vsyncadd [#allocation2], 4294967280 }
   0xb   :  { %10 = sfence }
   0xc   :  { %11 = vsyncpa [#allocation5], 0 }
   0xd   :  { %12 = vsyncpa [#allocation6], 0  ;;  %s241_s19 = smov [#allocation4]   ;;  %s182_s23 = scalar_lea.hbm %s312_s1, 2048 }
   0xe   :  { %s18_s20 = sshll.u32 %s241_s19, 4  ;;  %p183_p3 = scmp.ne.s32.totalorder %s312_s1, %s182_s23  ;;  %s19_s20 = int_to_ptr.vmem [resolvable:$true] %s18_s20 }
   0xf   :  { %p186_p4 = scmp.lt.u32.totalorder %s182_s23, %s312_s1 }
  0x11   :  { %p188_p5 = pnand %p186_p4, %p183_p3 }
  0x13   :  { %191 = shalt.err (!%p188_p5)
}
  0x14   :  { %s192_s0 = scalar_lea.vmem %s19_s20, 2048  ;;  %p197_p7 = scmp.lt.s32.totalorder %s19_s20, %s19_s20 }
  0x15   :  { %p193_p6 = scmp.ne.s32.totalorder %s19_s20, %s192_s0  ;;  %p198_p8 = scmp.lt.s32.totalorder %s192_s0, %s192_s0 }
  0x17   :  { %p199_p9 = por %p198_p8, %p197_p7 }
  0x19   :  { %p200_p10 = pnand %p199_p9, %p193_p6 }
  0x1b   :  { %203 = shalt.err (!%p200_p10)
}
  0x1c   :  { %s242_s28 = smov 128   ;;  %s243_s29 = smov 8  }
  0x1d   :  { %24 = dma.hbm_to_vmem [thread:$0]  %s312_s1, 2048, %s19_s20, [#allocation5], %s242_s28, %s242_s28, %s243_s29  }
  0x1e   :  { %232 = dma.done.wait [#allocation5], 2048  }
  0x1f   :  { %233 = vsyncadd [#allocation5], 4294965248  ;;  %s287_s4 = smov 0  }
  0x20 LB: > { %s144_s5 = sshll.u32 %s238_s4, 3  ;;  %s34_s4 = sadd.s32 1, %s238_s4   ;;  %s238_s4 = sphi %s287_s4, %s34_s4  }
  0x21   : > { %s37_s6 = sld [smem:[#allocation3 + %s144_s5]]  ;;  %s42_s7 = sadd.s32 1, %s144_s5 }
  0x22   : > { %s49_s8 = sadd.s32 2, %s144_s5  ;;  %s44_s9 = sld [smem:[#allocation3 + %s42_s7]] }
  0x23   : > { %s51_s10 = sld [smem:[#allocation3 + %s49_s8]]  ;;  %s56_s11 = sadd.s32 3, %s144_s5 }
  0x24   : > { %s63_s12 = sadd.s32 4, %s144_s5  ;;  %s58_s13 = sld [smem:[#allocation3 + %s56_s11]] }
  0x25   : > { %s65_s1 = sld [smem:[#allocation3 + %s63_s12]]  ;;  %s70_s14 = sadd.s32 5, %s144_s5 }
  0x26   : > { %s77_s15 = sadd.s32 6, %s144_s5  ;;  %s72_s16 = sld [smem:[#allocation3 + %s70_s14]] }
  0x27   : > { %s38_s17 = scalar_lea.vmem [#allocation4], %s37_s6  ;;  %s79_s18 = sld [smem:[#allocation3 + %s77_s15]] }
  0x28   : > { %v39_v0 = vld [vmem:[%s38_s17] sm:$0x1]  ;;  %s84_s19 = sadd.s32 7, %s144_s5  ;;  %s40_s20 = scalar_lea.vmem [#allocation7], %s144_s5 }
  0x29   : > { %41 = vst [vmem:[%s40_s20] sm:$0x1] %v39_v0  ;;  %s45_s21 = scalar_lea.vmem [#allocation4], %s44_s9  ;;  %s52_s22 = scalar_lea.vmem [#allocation4], %s51_s10 }
  0x2a   : > { %v46_v1 = vld [vmem:[%s45_s21] sm:$0x1]  ;;  %s86_s23 = sld [smem:[#allocation3 + %s84_s19]]  ;;  %s59_s24 = scalar_lea.vmem [#allocation4], %s58_s13 }
  0x2b   : > { %v53_v2 = vld [vmem:[%s52_s22] sm:$0x1]  ;;  %146 = vst [vmem:[%s40_s20 + $0x1] sm:$0x1] %v46_v1  ;;  %s66_s25 = scalar_lea.vmem [#allocation4], %s65_s1  ;;  %p31_p11 = scmp.ge.s32.totalorder %s34_s4, 2  }
  0x2c   : > { %148 = vst [vmem:[%s40_s20 + $0x2] sm:$0x1] %v53_v2  ;;  %v60_v3 = vld [vmem:[%s59_s24] sm:$0x1]  ;;  %s73_s26 = scalar_lea.vmem [#allocation4], %s72_s16  ;;  %s244_s30 = smov (%p31_p11), [#allocation7]  }
  0x2d   : > { %v67_v4 = vld [vmem:[%s66_s25] sm:$0x1]  ;;  %150 = vst [vmem:[%s40_s20 + $0x3] sm:$0x1] %v60_v3  ;;  %s80_s27 = scalar_lea.vmem [#allocation4], %s79_s18  ;;  %33 = sbr.rel (!%p31_p11) target bundleno = 32 (0x20), region = 51 }
  0x2e   : > { %152 = vst [vmem:[%s40_s20 + $0x4] sm:$0x1] %v67_v4  ;;  %v74_v5 = vld [vmem:[%s73_s26] sm:$0x1]  ;;  %s96_s3 = sshll.u32 (%p31_p11), %s244_s30, 4  ;;  %s97_s3 = int_to_ptr.vmem [resolvable:$true] %s96_s3 }
  0x2f   : > { %154 = vst [vmem:[%s40_s20 + $0x5] sm:$0x1] %v74_v5  ;;  %v81_v6 = vld [vmem:[%s80_s27] sm:$0x1]  ;;  %s204_s5 = scalar_lea.vmem (%p31_p11), %s97_s3, 256  ;;  %p209_p13 = scmp.lt.s32.totalorder (%p31_p11), %s97_s3, %s97_s3 }
  0x30   : > { %156 = vst [vmem:[%s40_s20 + $0x6] sm:$0x1] %v81_v6  ;;  %s87_s0 = scalar_lea.vmem [#allocation4], %s86_s23  ;;  %p205_p12 = scmp.ne.s32.totalorder (%p31_p11), %s97_s3, %s204_s5 }
  0x31   : > { %v88_v7 = vld [vmem:[%s87_s0] sm:$0x1]  ;;  %p210_p0 = scmp.lt.s32.totalorder (%p31_p11), %s204_s5, %s204_s5 }
  0x32   : > { %158 = vst [vmem:[%s40_s20 + $0x7] sm:$0x1] %v88_v7 }
  0x33   :  { %p211_p1 = por (%p31_p11), %p210_p0, %p209_p13 }
  0x35   :  { %p212_p2 = pnand %p211_p1, %p205_p12 }
  0x37   :  { %215 = shalt.err (!%p212_p2)
}
  0x38   :  { %s216_s8 = scalar_lea.hbm %s313_s2, 256 }
  0x39   :  { %p217_p3 = scmp.ne.s32.totalorder %s313_s2, %s216_s8  ;;  %p220_p4 = scmp.lt.u32.totalorder %s216_s8, %s313_s2 }
  0x3b   :  { %p222_p5 = pnand %p220_p4, %p217_p3 }
  0x3d   :  { %225 = shalt.err (!%p222_p5)
}
  0x3e   :  { %102 = dma.vmem_to_hbm [thread:$0]  %s97_s3, 256, %s313_s2, [#allocation6], %s242_s28, %s242_s28, %s243_s29  }
  0x3f   :  { %234 = dma.done.wait [#allocation6], 256  }
  0x40   :  { %235 = vsyncadd [#allocation6], 4294967040 }
  0x41   :  { %106 = vsyncpa [#allocation5], 1 }
  0x42   :  { %107 = vsyncpa [#allocation6], 1 }

</bundles_post_ra>
